<compile_context>
chip_gen: v6e
topology: v6e:2x2x1
jax: 0.10.0
libtpu: 0.0.40
codegen_flags: <defaults>
</compile_context>

<pallas_src>
import functools

import jax
import jax.numpy as jnp
from jax.experimental import pallas as pl
from jax.experimental.pallas import tpu as pltpu

_LANES = 512          # lane-dense slab width (multiple of 128)
_MAX_TILE_ROWS = 512  # rows per grid tile -> ~1 MiB f32 per block


def _reduce_kernel(x_ref, o_ref, *, bitW: int, rows: int):
    """Accumulate sum(|x|) (bitW==1) or max(|tanh x|) (bitW>1) into a (1,1) block."""
    @pl.when(pl.program_id(0) == 0)
    def _():
        o_ref[...] = jnp.zeros_like(o_ref)

    x = x_ref[...].astype(jnp.float32)
    v = jnp.abs(x) if bitW == 1 else jnp.abs(jnp.tanh(x))

    tile_rows = x_ref.shape[0]
    if rows % tile_rows != 0:
        # Last grid block is partial: rows past `rows` hold unspecified data.
        row_ids = (jax.lax.broadcasted_iota(jnp.int32, v.shape, 0)
                   + pl.program_id(0) * tile_rows)
        v = jnp.where(row_ids < rows, v, 0.0)  # 0 is neutral for sum and max(|.|)

    if bitW == 1:
        o_ref[...] = o_ref[...] + jnp.sum(v)
    else:
        o_ref[...] = jnp.maximum(o_ref[...], jnp.max(v))


def _apply_kernel(s_ref, x_ref, o_ref, *, bitW: int):
    """Elementwise quantization using precomputed scalars held in SMEM."""
    x = x_ref[...].astype(jnp.float32)
    if bitW == 1:
        e = s_ref[0]
        y = jnp.sign(x) * e                    # sign(x/E)*E == sign(x)*E for E > 0
    else:
        n = float(2 ** bitW - 1)
        s1 = s_ref[0]                          # 0.5 * n / m
        s2 = s_ref[1]                          # 2 * m / n
        m = s_ref[2]                           # max |tanh(x)|
        t = jnp.tanh(x)
        y = jnp.round(t * s1 + 0.5 * n) * s2 - m
    o_ref[...] = y.astype(o_ref.dtype)


def fw_forward(x: jax.Array, bitW: int) -> jax.Array:
    """JAX/Pallas equivalent of fw(bitW).forward(x)."""
    if bitW == 32:
        return x

    orig_shape = x.shape
    orig_dtype = x.dtype
    n_elems = int(x.size)

    # Lane-dense 2-D view (rows, 512) in the original dtype. The pad / slice
    # copies only trigger when n_elems is not a multiple of 512 (zero-cost
    # reshape otherwise, which is the common case for weight tensors).
    pad = (-n_elems) % _LANES
    xf = x.reshape(-1)
    if pad:
        xf = jnp.concatenate([xf, jnp.zeros((pad,), xf.dtype)])
    rows = (n_elems + pad) // _LANES
    x2 = xf.reshape(rows, _LANES)

    tile_rows = min(_MAX_TILE_ROWS, rows)
    n_tiles = pl.cdiv(rows, tile_rows)

    # ---- Phase 1: global reduction (sum |x| or max |tanh x|) -> (1,1) scalar.
    red = pl.pallas_call(
        functools.partial(_reduce_kernel, bitW=bitW, rows=rows),
        out_shape=jax.ShapeDtypeStruct((1, 1), jnp.float32),
        grid=(n_tiles,),
        in_specs=[pl.BlockSpec((tile_rows, _LANES), lambda i: (i, 0))],
        out_specs=pl.BlockSpec((1, 1), lambda i: (0, 0)),
        compiler_params=pltpu.CompilerParams(
            dimension_semantics=("arbitrary",)),
    )(x2)
    r = red[0, 0]

    # Fold the per-element arithmetic into a few scalars, computed once here.
    if bitW == 1:
        e = r / jnp.float32(n_elems)           # E = mean(|x|)
        scalars = jnp.stack([e, e, e]).astype(jnp.float32)
    else:
        n = jnp.float32(2 ** bitW - 1)
        m = r                                  # max |tanh(x)|
        scalars = jnp.stack([0.5 * n / m, 2.0 * m / n, m]).astype(jnp.float32)

    # ---- Phase 2: elementwise quantization ("parallel" axis so v7x can split
    # the bandwidth-bound apply pass across both TensorCores).
    out2 = pl.pallas_call(
        functools.partial(_apply_kernel, bitW=bitW),
        out_shape=jax.ShapeDtypeStruct((rows, _LANES), orig_dtype),
        grid=(n_tiles,),
        in_specs=[
            pl.BlockSpec(memory_space=pltpu.MemorySpace.SMEM),
            pl.BlockSpec((tile_rows, _LANES), lambda i: (i, 0)),
        ],
        out_specs=pl.BlockSpec((tile_rows, _LANES), lambda i: (i, 0)),
        compiler_params=pltpu.CompilerParams(
            dimension_semantics=("parallel",)),
    )(scalars, x2)

    out = out2.reshape(-1)
    if pad:
        out = out[:n_elems]
    return out.reshape(orig_shape)


def _fw_reference(x: jax.Array, bitW: int) -> jax.Array:
    """Pure-JAX reference mirroring the PyTorch module."""
    if bitW == 32:
        return x
    x32 = x.astype(jnp.float32)
    if bitW == 1:
        e = jnp.mean(jnp.abs(x32))
        return (jnp.sign(x32 / e) * e).astype(x.dtype)
    t = jnp.tanh(x32)
    m = jnp.max(jnp.abs(t))
    q = t / m * 0.5 + 0.5
    n = float(2 ** bitW - 1)
    q = jnp.round(q * n) / n
    return ((2.0 * q - 1.0) * m).astype(x.dtype)


def _match(y, y_ref, x, bitW, atol=1e-5, rtol=1e-5) -> bool:
    """Elementwise comparison; for bitW>1, positions whose pre-round argument
    sits essentially on a round-to-nearest tie may legitimately land one
    quantization level apart (the kernel folds 1/max into a scalar, differing
    from the reference's exact divide by ~1 ulp), so those are exempted."""
    close = jnp.abs(y.astype(jnp.float32) - y_ref.astype(jnp.float32)) \
        <= atol + rtol * jnp.abs(y_ref.astype(jnp.float32))
    if bitW in (1, 32):
        return bool(jnp.all(close))
    x32 = x.astype(jnp.float32)
    t = jnp.tanh(x32)
    m = jnp.max(jnp.abs(t))
    n = float(2 ** bitW - 1)
    u = (t / m * 0.5 + 0.5) * n
    near_tie = jnp.abs(u - jnp.floor(u) - 0.5) < 1e-4
    return bool(jnp.all(close | near_tie))


if __name__ == "__main__":
    # Primary small test: NCHW-like tensor (single tile path).
    x_small = jax.random.normal(jax.random.PRNGKey(0), (2, 4, 16, 16),
                                dtype=jnp.float32)
    # Multi-tile test: conv-weight-sized tensor -> 2 grid tiles, partial last
    # block exercises the in-kernel row mask.
    x_multi = jax.random.normal(jax.random.PRNGKey(1), (256, 128, 3, 3),
                                dtype=jnp.float32)
    # Ragged test: element count not divisible by 512 -> wrapper pad path.
    x_ragged = jax.random.normal(jax.random.PRNGKey(2), (3, 5, 7, 7),
                                 dtype=jnp.float32)

    ok = True
    for xt in (x_small, x_multi, x_ragged):
        for bitW in (1, 2, 4, 32):
            y = jax.block_until_ready(fw_forward(xt, bitW))
            y_ref = jax.block_until_ready(_fw_reference(xt, bitW))
            if y.shape != xt.shape or y.dtype != xt.dtype:
                ok = False
            if not _match(y, y_ref, xt, bitW):
                ok = False

    print("KERNEL_OK" if ok else "KERNEL_MISMATCH")
</pallas_src>

<mosaic_0001>
module attributes {stable_mosaic.version = 11 : i64} {
  func.func @_reduce_kernel(%arg0: i32, %arg1: memref<4x512xf32, #tpu.memory_space<vmem>>, %arg2: memref<1x1xf32, #tpu.memory_space<vmem>>) attributes {dimension_semantics = [#tpu.dimension_semantics<arbitrary>], iteration_bounds = array<i64: 1>, scalar_prefetch = 0 : i64, scratch_operands = 0 : i64, tpu.core_type = #tpu.core_type<tc>, window_params = [{transform_indices = @transform_0, window_bounds = array<i64: 4, 512>}, {pipeline_mode = #tpu.pipeline_mode<synchronous>, transform_indices = @transform_1, window_bounds = array<i64: 1, 1>}]} {
    %c0_i32 = arith.constant 0 : i32
    %0 = arith.cmpi eq, %arg0, %c0_i32 : i32
    %1 = arith.extui %0 : i1 to i32
    %c0_i32_0 = arith.constant 0 : i32
    %2 = arith.cmpi ne, %1, %c0_i32_0 : i32
    scf.if %2 {
      %cst_6 = arith.constant 0.000000e+00 : f32
      %13 = vector.broadcast %cst_6 : f32 to vector<1x1xf32>
      %c0_7 = arith.constant 0 : index
      %c0_8 = arith.constant 0 : index
      %14 = vector.load %arg2[%c0_7, %c0_8] : memref<1x1xf32, #tpu.memory_space<vmem>>, vector<1x1xf32>
      tpu.vector_store %arg2[%c0_7, %c0_8], %13 {strides = array<i32>} : memref<1x1xf32, #tpu.memory_space<vmem>>, vector<1x1xf32>,
    } else {
    }
    %c0 = arith.constant 0 : index
    %c0_1 = arith.constant 0 : index
    %3 = vector.load %arg1[%c0, %c0_1] : memref<4x512xf32, #tpu.memory_space<vmem>>, vector<4x512xf32>
    %4 = math.absf %3 : vector<4x512xf32>
    %c0_2 = arith.constant 0 : index
    %c0_3 = arith.constant 0 : index
    %5 = vector.load %arg2[%c0_2, %c0_3] : memref<1x1xf32, #tpu.memory_space<vmem>>, vector<1x1xf32>
    %6 = vector.shape_cast %4 : vector<4x512xf32> to vector<1x4x512xf32>
    %cst = arith.constant dense<0.000000e+00> : vector<1xf32>
    %7 = vector.multi_reduction <add>, %6, %cst [1, 2] : vector<1x4x512xf32> to vector<1xf32>
    %8 = vector.shape_cast %7 : vector<1xf32> to vector<1x1x1xf32>
    %9 = vector.extract %8[0, 0, 0] : f32 from vector<1x1x1xf32>
    %10 = vector.broadcast %9 : f32 to vector<1x1xf32>
    %11 = arith.addf %5, %10 : vector<1x1xf32>
    %c0_4 = arith.constant 0 : index
    %c0_5 = arith.constant 0 : index
    %12 = vector.load %arg2[%c0_4, %c0_5] : memref<1x1xf32, #tpu.memory_space<vmem>>, vector<1x1xf32>
    tpu.vector_store %arg2[%c0_4, %c0_5], %11 {strides = array<i32>} : memref<1x1xf32, #tpu.memory_space<vmem>>, vector<1x1xf32>,
    return
  }
  func.func @transform_0(%arg0: i32) -> (i32, i32) {
    %c0_i32 = arith.constant 0 : i32
    %c0_i32_0 = arith.constant 0 : i32
    return %arg0, %c0_i32 : i32, i32
  }
  func.func @transform_1(%arg0: i32) -> (i32, i32) {
    %c0_i32 = arith.constant 0 : i32
    %c0_i32_0 = arith.constant 0 : i32
    %c0_i32_1 = arith.constant 0 : i32
    return %c0_i32, %c0_i32_0 : i32, i32
  }
}

</mosaic_0001>

<bundles_post_ra>
// kernel: tpu_custom_call.1
= control target key start
LH: loop header
LB: loop body
LE: loop exit
PB: predicated region body
PF: predicated region fallthrough
CT: control target
= control target key end

     0   :  { %6 = vsyncpa [#allocation3], 0  ;;  %s144_s0 = inlined_call_operand.hbm [shape: f32[4,512], index: 0, kind: input, shape index: {}]   ;;  %s145_s1 = inlined_call_operand.hbm [shape: f32[1,1], index: 1, kind: output, shape index: {}]  }
   0x1   :  { %7 = vsyncpa [#allocation4], 0  ;;  %s123_s6 = smov [#allocation2]  }
   0x2   :  { %s14_s7 = sshll.u32 %s123_s6, 4  ;;  %s15_s7 = int_to_ptr.vmem [resolvable:$true] %s14_s7 }
   0x3   :  { %s87_s8 = scalar_lea.vmem %s15_s7, 256  ;;  %p92_p1 = scmp.lt.s32.totalorder %s15_s7, %s15_s7 }
   0x4   :  { %p88_p0 = scmp.ne.s32.totalorder %s15_s7, %s87_s8  ;;  %p93_p2 = scmp.lt.s32.totalorder %s87_s8, %s87_s8 }
   0x6   :  { %p94_p3 = por %p93_p2, %p92_p1 }
   0x8   :  { %p95_p4 = pnand %p94_p3, %p88_p0 }
   0xa   :  { %98 = shalt.err (!%p95_p4)
}
   0xb   :  { %17 = dma.hbm_to_vmem [thread:$0]  %s144_s0, 256, %s15_s7, [#allocation3]  }
   0xc   :  { %119 = dma.done.wait [#allocation3], 256  }
   0xd   :  { %120 = vsyncadd [#allocation3], 4294967040  ;;  %vm25_vm0 = vcmask 0   ;;  %v124_v0 = vmov 0.0   ;;  %v27_v1 = vld [vmem:[#allocation2] sm:$0xff]  ;;  %v28_v2 = vld [vmem:[#allocation2 + $0x8] sm:$0xff] }
   0xe   :  { %26 = vst.msk [vmem:[#allocation5] sm:$0x1] %vm25_vm0, %v124_v0  ;;  %vm38_vm1 = vcmask 1043456   ;;  %v29_v3 = vand.u32 2147483647, %v27_v1  ;;  %s125_s0 = smov [#allocation5]  }
   0xf   :  { %v30_v4 = vand.u32 2147483647, %v28_v2  ;;  %s65_s11 = sshll.u32 %s125_s0, 4  ;;  %s66_s11 = int_to_ptr.vmem [resolvable:$true] %s65_s11 }
  0x10   :  { %v34_v5 = vcombine.high %v29_v3, %v29_v3  ;;  %v39_v7 = vsel %vm38_vm1, %v29_v3, 0.0  ;;  %s99_s13 = scalar_lea.vmem %s66_s11, 16  ;;  %s103_s14 = scalar_lea.vmem %s66_s11, 32 }
  0x11   :  { %v35_v6 = vcombine.high %v30_v4, %v30_v4  ;;  %v42_v9 = vsel %vm38_vm1, %v30_v4, 0.0  ;;  %p100_p5 = scmp.ne.s32.totalorder %s66_s11, %s99_s13  ;;  %p104_p6 = scmp.lt.s32.totalorder %s66_s11, %s66_s11 }
  0x12   :  { %v40_v8 = vsel %vm38_vm1, %v34_v5, 0.0  ;;  %p105_p7 = scmp.lt.s32.totalorder %s103_s14, %s99_s13 }
  0x13   :  { %v41_v10 = vadd.f32 %v40_v8, %v39_v7  ;;  %v44_v11 = vsel %vm38_vm1, %v35_v6, 0.0 }
  0x14   :  { %p106_p8 = por %p105_p7, %p104_p6 }
  0x15   :  { %v43_v12 = vadd.f32 %v42_v9, %v41_v10  ;;  %v31_v21 = vld [vmem:[#allocation5] sm:$0x1] }
  0x16   :  { %p107_p9 = pnand %p106_p8, %p100_p5 }
  0x17   :  { %v45_v13 = vadd.f32 %v44_v11, %v43_v12 }
  0x19   :  { %46 = vadd.xlane.f32.xlu0 %v45_v13 }
  0xa2   :  { %v47_v14 = vpop.xlane.xlu0 %46 }
  0xa3   :  { %v48_v15 = vrot.slane %v47_v14, 4 }
  0xa5   :  { %v49_v16 = vadd.f32 %v48_v15, %v47_v14 }
  0xa7   :  { %v50_v17 = vrot.slane %v49_v16, 2 }
  0xa9   :  { %v51_v18 = vadd.f32 %v50_v17, %v49_v16 }
  0xab   :  { %v52_v19 = vrot.slane %v51_v18, 1 }
  0xad   :  { %v53_v20 = vadd.f32 %v52_v19, %v51_v18 }
  0xaf   :  { %74 = vpush %v53_v20 }
  0xe0   :  { %s75_s12 = spop %74 }
  0xe1   :  { %v55_v22 = vstv %s75_s12 }
  0xe2   :  { %v56_v23 = vadd.f32 %v55_v22, %v31_v21 }
  0xe4   :  { %58 = vst.msk [vmem:[#allocation5] sm:$0x1] %vm25_vm0, %v56_v23 }
  0xe5   :  { %110 = shalt.err (!%p107_p9)
}
  0xe6   :  { %68 = dma.vmem_to_hbm [thread:$0]  %s66_s11, 16, %s145_s1, [#allocation4]  }
  0xe7   :  { %121 = dma.done.wait [#allocation4], 16  }
  0xe8   :  { %122 = vsyncadd [#allocation4], 4294967280 }
  0xe9   :  { %72 = vsyncpa [#allocation3], 1 }
  0xea   :  { %73 = vsyncpa [#allocation4], 1 }

</bundles_post_ra>
